<compile_context>
chip_gen: v5e
topology: v5e:2x2
jax: 0.10.0
libtpu: 0.0.40
codegen_flags: <defaults>
</compile_context>

<pallas_src>
import functools
import math

import jax
import jax.numpy as jnp
from jax import lax
from jax.experimental import pallas as pl
from jax.experimental.pallas import tpu as pltpu


# ---------------------------------------------------------------------------
# Kernels
# ---------------------------------------------------------------------------

def _adacos_stats_kernel(s_ref, x_ref, wt_ref, cos_ref, rowsum_ref, xn_ref):
    """One (TB, TC) tile: cosine logits + per-row sum_c exp(s*cos)."""
    j = pl.program_id(1)

    @pl.when(j == 0)
    def _init():
        # Normalize the x tile once per B-tile (f32 math, EUP rsqrt) and cache it in bf16.
        x = x_ref[...].astype(jnp.float32)
        inv_norm = lax.rsqrt(jnp.maximum(jnp.sum(x * x, axis=-1, keepdims=True), 1e-24))
        xn_ref[...] = (x * inv_norm).astype(xn_ref.dtype)
        rowsum_ref[...] = jnp.zeros_like(rowsum_ref)

    # MXU: (TB, F) bf16 @ (F, TC) bf16 -> (TB, TC) f32.
    cos = jnp.dot(xn_ref[...], wt_ref[...], preferred_element_type=jnp.float32)
    cos_ref[...] = cos.astype(cos_ref.dtype)

    # Full-row sum; the target class is subtracted out in the XLA glue.  rowsum is an output
    # block that stays resident in VMEM across the class ("arbitrary") axis, so accumulate in it.
    rowsum_ref[...] += jnp.sum(jnp.exp(s_ref[0] * cos), axis=-1, keepdims=True)


def _adacos_proj_kernel(x_ref, wt_ref, cos_ref, xn_ref):
    """target=None path: pure normalized matmul, no exp / reductions."""
    @pl.when(pl.program_id(1) == 0)
    def _init():
        x = x_ref[...].astype(jnp.float32)
        inv_norm = lax.rsqrt(jnp.maximum(jnp.sum(x * x, axis=-1, keepdims=True), 1e-24))
        xn_ref[...] = (x * inv_norm).astype(xn_ref.dtype)

    cos_ref[...] = jnp.dot(xn_ref[...], wt_ref[...],
                           preferred_element_type=jnp.float32).astype(cos_ref.dtype)


# ---------------------------------------------------------------------------
# Tiling helpers
# ---------------------------------------------------------------------------

def _round_up(x, m):
    return ((x + m - 1) // m) * m


def _pick_class_tile(dim, pref, aligns=(256, 128)):
    """Largest tile <= pref that divides dim and is a multiple of one of `aligns`;
    falls back to the full dim (always legal for a BlockSpec)."""
    if dim <= pref:
        return dim
    for align in aligns:
        t = (pref // align) * align
        while t >= align:
            if dim % t == 0:
                return t
            t -= align
    return dim


def _vmem_info():
    """(usable budget, physical capacity) of VMEM in bytes, generation-aware."""
    try:
        cap = int(pltpu.get_tpu_info().vmem_capacity_bytes)
    except Exception:  # pragma: no cover - conservative fallback (assume smallest / v7x part)
        cap = 64 * 2 ** 20
    budget = max(32 * 2 ** 20, min(cap - 16 * 2 ** 20, 100 * 2 ** 20))
    return budget, cap


def _tile_bytes(tb, tc, F, x_item, cos_item):
    return (2 * tb * F * x_item        # x tile (double-buffered by the pipeline)
            + 2 * F * tc * 2           # normalized W^T tile, bf16
            + 2 * tb * tc * cos_item   # cos output tile
            + 2 * tb * 4               # rowsum output tile
            + tb * F * 2)              # scratch: cached normalized x (bf16)


def _choose_tiles(B, C, F, x_item, cos_item, budget, split_batch):
    # Batch tile: whole (padded) batch so the weight streams from HBM once.
    if B >= 128:
        align = 128
    elif B >= 16:
        align = 16                      # bf16 sublane pack of the xn scratch
    else:
        align = 8
    TB = _round_up(B, align)
    if split_batch and TB >= 256:
        # 2 TensorCores per chip (v7x): keep >= 2 batch tiles on the "parallel" axis so both
        # cores work; paying 2x weight reads for 2x MXU throughput.
        TB = _round_up((TB + 1) // 2, align)

    tc_pref = 1024
    TC = _pick_class_tile(C, tc_pref)
    while _tile_bytes(TB, TC, F, x_item, cos_item) > budget and tc_pref > 256:
        tc_pref //= 2
        TC = _pick_class_tile(C, tc_pref)
    while _tile_bytes(TB, TC, F, x_item, cos_item) > budget and TB > align:
        TB = max(align, _round_up(TB // 2, align))
    # TODO(synk): add a K grid axis over F if a single (TB, F) x-tile still overflows VMEM.
    return TB, TC


# ---------------------------------------------------------------------------
# Public API
# ---------------------------------------------------------------------------

def prepare_adacos_weight(weight):
    """L2-normalize the (C, F) classifier weight and return it as an (F, C) bf16 matrix.

    Call once per optimizer step and pass it to adacos_forward(..., weight_prepared=True) to
    avoid an extra full-weight HBM pass on every forward call.
    """
    w32 = weight.astype(jnp.float32)
    inv = lax.rsqrt(jnp.maximum(jnp.sum(w32 * w32, axis=-1, keepdims=True), 1e-24))
    return jnp.transpose(w32 * inv).astype(jnp.bfloat16)   # (F, C)


@functools.partial(
    jax.jit, static_argnames=("eps", "weight_prepared", "return_scale", "apply_scale"))
def adacos_forward(x, weight, target=None, s=None, *, eps=1e-6,
                   weight_prepared=False, return_scale=False, apply_scale=True):
    """Functional AdaCos.forward. `s` is the running scale (defaults to sqrt(2)*log(C-1))."""
    B, F = x.shape
    if weight_prepared:
        wn_t = weight.astype(jnp.bfloat16)            # already normalized, (F, C)
        Fw, C = wn_t.shape
    else:
        C, Fw = weight.shape
        wn_t = prepare_adacos_weight(weight)          # fused into this jit (single weight pass)
    assert Fw == F

    if s is None:
        s = math.sqrt(2.0) * math.log(C - 1)

    # NOTE: set cos_dtype = jnp.bfloat16 to halve (B, C) writeback traffic if the ~1e-3 cosine
    # deviation (amplified by exp(s*cos) / arccos near |cos|~1) is acceptable for your training.
    cos_dtype = jnp.float32
    x_item = jnp.dtype(x.dtype).itemsize
    cos_item = jnp.dtype(cos_dtype).itemsize

    budget, vmem_cap = _vmem_info()
    split_batch = vmem_cap <= 80 * 2 ** 20            # 64-MiB-VMEM parts (v7x) have 2 TCs/chip
    TB, TC = _choose_tiles(B, C, F, x_item, cos_item, budget, split_batch)

    Bp = _round_up(B, TB)
    x_in = x if Bp == B else jnp.pad(x, ((0, Bp - B), (0, 0)))

    grid = (Bp // TB, pl.cdiv(C, TC))
    x_spec = pl.BlockSpec((TB, F), lambda i, j: (i, 0))          # resident over the class axis
    # TODO(synk): sweep pipeline_mode=pl.Buffered(3) on w_spec if xprof shows DMA waits at
    # class-tile boundaries (cos writeback serializing with the next weight fetch).
    w_spec = pl.BlockSpec((F, TC), lambda i, j: (0, j))
    cos_spec = pl.BlockSpec((TB, TC), lambda i, j: (i, j))
    compiler_params = pltpu.CompilerParams(
        dimension_semantics=("parallel", "arbitrary"),
        vmem_limit_bytes=int(budget),
    )

    if target is None:
        # Projection on centroids: stats-free kernel (pure normalized matmul).
        cos = pl.pallas_call(
            _adacos_proj_kernel,
            out_shape=jax.ShapeDtypeStruct((Bp, C), cos_dtype),
            grid_spec=pltpu.PrefetchScalarGridSpec(
                num_scalar_prefetch=0,
                grid=grid,
                in_specs=[x_spec, w_spec],
                out_specs=cos_spec,
                scratch_shapes=[pltpu.VMEM((TB, F), jnp.bfloat16)],
            ),
            compiler_params=compiler_params,
        )(x_in, wn_t)
        return cos[:B].astype(jnp.float32)

    s_arr = jnp.asarray(s, jnp.float32).reshape(1)
    cos, rowsum = pl.pallas_call(
        _adacos_stats_kernel,
        out_shape=(
            jax.ShapeDtypeStruct((Bp, C), cos_dtype),
            jax.ShapeDtypeStruct((Bp, 1), jnp.float32),
        ),
        grid_spec=pltpu.PrefetchScalarGridSpec(
            num_scalar_prefetch=0,
            grid=grid,
            in_specs=[
                pl.BlockSpec(memory_space=pltpu.MemorySpace.SMEM),   # s, (1,) runtime scalar
                x_spec,
                w_spec,
            ],
            out_specs=(
                cos_spec,
                pl.BlockSpec((TB, 1), lambda i, j: (i, 0)),          # sum_c exp(s*cos)
            ),
            scratch_shapes=[pltpu.VMEM((TB, F), jnp.bfloat16)],      # cached normalized x
        ),
        compiler_params=compiler_params,
    )(s_arr, x_in, wn_t)

    cos = cos[:B].astype(jnp.float32)
    rowsum = rowsum[:B, 0]

    # O(B) scalar statistics (the torch.no_grad() block) + scale update: plain XLA glue.
    tgt = target.astype(jnp.int32).reshape(B, 1)
    cos_tgt = jnp.take_along_axis(cos, tgt, axis=1)[:, 0]
    s_old = jnp.asarray(s, jnp.float32)
    b_sum = rowsum - jnp.exp(s_old * cos_tgt)          # sum over non-target classes only
    b_avg = jnp.mean(b_sum)
    theta_tgt = jnp.arccos(jnp.clip(cos_tgt, -1.0 + eps, 1.0 - eps))
    theta_med = jnp.sort(theta_tgt)[(B - 1) // 2]      # torch.median == lower median (keep as-is)
    theta_med = jnp.minimum(jnp.float32(math.pi / 4), theta_med)
    s_new = jnp.log(b_avg) / jnp.cos(theta_med)        # updated dynamical scale

    if not apply_scale:
        # Consumer fuses s_new*cos (e.g. inside softmax-CE); skips one full (B, C) HBM pass.
        return cos, s_new
    logits = s_new * cos
    if return_scale:
        return logits, s_new
    return logits


if __name__ == "__main__":
    B, F, C = 8, 32, 16                                # batch, in_features, out_features

    key = jax.random.PRNGKey(0)
    kx, kw, kt = jax.random.split(key, 3)

    x = jax.random.normal(kx, (B, F), dtype=jnp.float32)
    bound = math.sqrt(6.0 / (F + C))                   # xavier_uniform for the (C, F) weight
    weight = jax.random.uniform(kw, (C, F), minval=-bound, maxval=bound, dtype=jnp.float32)
    target = jax.random.randint(kt, (B,), 0, C, dtype=jnp.int32)

    # Step 1: default initial scale, returns logits and the updated dynamical scale.
    logits, s_new = adacos_forward(x, weight, target, return_scale=True)
    jax.block_until_ready(logits)
    assert logits.shape == (B, C) and logits.dtype == jnp.float32
    assert bool(jnp.isfinite(logits).all())

    # Step 2: thread the running scale (mirrors the module's self.s update) and reuse a
    # prepared weight (normalize+transpose+bf16 hoisted out of the per-call forward).
    wn_t = prepare_adacos_weight(weight)
    logits2 = adacos_forward(x, wn_t, target, s_new, weight_prepared=True)
    jax.block_until_ready(logits2)
    assert logits2.shape == (B, C)

    # Consumer-side fusion path: raw cosine + new scale, no materialized logits.
    cos_t, s3 = adacos_forward(x, weight, target, apply_scale=False)
    jax.block_until_ready(cos_t)
    assert cos_t.shape == (B, C) and s3.shape == ()

    # target=None path returns the raw cosine projection via the stats-free kernel.
    cos_only = adacos_forward(x, weight, None)
    jax.block_until_ready(cos_only)
    assert cos_only.shape == (B, C)

    # Cross-check the cosine projection against a plain-XLA reference (bf16 MXU tolerance).
    xn = x / jnp.maximum(jnp.linalg.norm(x, axis=1, keepdims=True), 1e-12)
    wn = weight / jnp.maximum(jnp.linalg.norm(weight, axis=1, keepdims=True), 1e-12)
    assert bool(jnp.allclose(cos_only, xn @ wn.T, atol=1e-2))

    print("KERNEL_OK")
</pallas_src>

<mosaic_0001>
module attributes {stable_mosaic.version = 11 : i64} {
  func.func @_adacos_stats_kernel(%arg0: i32, %arg1: i32, %arg2: memref<1xf32, #tpu.memory_space<smem>>, %arg3: memref<8x32xf32, #tpu.memory_space<vmem>>, %arg4: memref<32x16xbf16, #tpu.memory_space<vmem>>, %arg5: memref<8x16xf32, #tpu.memory_space<vmem>>, %arg6: memref<8x1xf32, #tpu.memory_space<vmem>>, %arg7: memref<8x32xbf16, #tpu.memory_space<vmem>>) attributes {dimension_semantics = [#tpu.dimension_semantics<parallel>, #tpu.dimension_semantics<arbitrary>], iteration_bounds = array<i64: 1, 1>, scalar_prefetch = 0 : i64, scratch_operands = 1 : i64, tpu.core_type = #tpu.core_type<tc>, window_params = [{transform_indices = @transform_0, window_bounds = array<i64: 1>}, {transform_indices = @transform_1, window_bounds = array<i64: 8, 32>}, {transform_indices = @transform_2, window_bounds = array<i64: 32, 16>}, {transform_indices = @transform_3, window_bounds = array<i64: 8, 16>}, {transform_indices = @transform_4, window_bounds = array<i64: 8, 1>}]} {
    %c0_i32 = arith.constant 0 : i32
    %0 = arith.cmpi eq, %arg1, %c0_i32 : i32
    %1 = arith.extui %0 : i1 to i32
    %c0_i32_0 = arith.constant 0 : i32
    %2 = arith.cmpi ne, %1, %c0_i32_0 : i32
    scf.if %2 {
      %c0_12 = arith.constant 0 : index
      %c0_13 = arith.constant 0 : index
      %16 = vector.load %arg3[%c0_12, %c0_13] : memref<8x32xf32, #tpu.memory_space<vmem>>, vector<8x32xf32>
      %17 = arith.mulf %16, %16 : vector<8x32xf32>
      %cst_14 = arith.constant dense<0.000000e+00> : vector<8xf32>
      %18 = vector.multi_reduction <add>, %17, %cst_14 [1] : vector<8x32xf32> to vector<8xf32>
      %19 = vector.shape_cast %18 : vector<8xf32> to vector<8x1xf32>
      %cst_15 = arith.constant 1.000000e-24 : f32
      %20 = vector.broadcast %cst_15 : f32 to vector<8x1xf32>
      %21 = arith.maximumf %19, %20 : vector<8x1xf32>
      %22 = math.rsqrt %21 : vector<8x1xf32>
      %23 = vector.broadcast %22 : vector<8x1xf32> to vector<8x32xf32>
      %24 = arith.mulf %16, %23 : vector<8x32xf32>
      %25 = arith.truncf %24 : vector<8x32xf32> to vector<8x32xbf16>
      %c0_16 = arith.constant 0 : index
      %c0_17 = arith.constant 0 : index
      %26 = vector.load %arg7[%c0_16, %c0_17] : memref<8x32xbf16, #tpu.memory_space<vmem>>, vector<8x32xbf16>
      tpu.vector_store %arg7[%c0_16, %c0_17], %25 {strides = array<i32>} : memref<8x32xbf16, #tpu.memory_space<vmem>>, vector<8x32xbf16>,
      %cst_18 = arith.constant 0.000000e+00 : f32
      %27 = vector.broadcast %cst_18 : f32 to vector<8x1xf32>
      %c0_19 = arith.constant 0 : index
      %c0_20 = arith.constant 0 : index
      %28 = vector.load %arg6[%c0_19, %c0_20] : memref<8x1xf32, #tpu.memory_space<vmem>>, vector<8x1xf32>
      tpu.vector_store %arg6[%c0_19, %c0_20], %27 {strides = array<i32>} : memref<8x1xf32, #tpu.memory_space<vmem>>, vector<8x1xf32>,
    } else {
    }
    %c0 = arith.constant 0 : index
    %c0_1 = arith.constant 0 : index
    %3 = vector.load %arg7[%c0, %c0_1] : memref<8x32xbf16, #tpu.memory_space<vmem>>, vector<8x32xbf16>
    %c0_2 = arith.constant 0 : index
    %c0_3 = arith.constant 0 : index
    %4 = vector.load %arg4[%c0_2, %c0_3] : memref<32x16xbf16, #tpu.memory_space<vmem>>, vector<32x16xbf16>
    %cst = arith.constant dense<0.000000e+00> : vector<8x16xf32>
    %5 = tpu.matmul %3, %4, %cst {dimension_numbers = #tpu.dot_dimension_numbers<[1], [0], [0], [1], [0, 0, 1, 1], [], []>} : vector<8x32xbf16>, vector<32x16xbf16>, vector<8x16xf32> -> vector<8x16xf32>
    %c0_4 = arith.constant 0 : index
    %c0_5 = arith.constant 0 : index
    %6 = vector.load %arg5[%c0_4, %c0_5] : memref<8x16xf32, #tpu.memory_space<vmem>>, vector<8x16xf32>
    tpu.vector_store %arg5[%c0_4, %c0_5], %5 {strides = array<i32>} : memref<8x16xf32, #tpu.memory_space<vmem>>, vector<8x16xf32>,
    %c0_6 = arith.constant 0 : index
    %c0_7 = arith.constant 0 : index
    %7 = vector.load %arg6[%c0_6, %c0_7] : memref<8x1xf32, #tpu.memory_space<vmem>>, vector<8x1xf32>
    %c0_8 = arith.constant 0 : index
    %8 = memref.load %arg2[%c0_8] : memref<1xf32, #tpu.memory_space<smem>>
    %9 = vector.broadcast %8 : f32 to vector<8x16xf32>
    %10 = arith.mulf %9, %5 : vector<8x16xf32>
    %11 = math.exp %10 : vector<8x16xf32>
    %cst_9 = arith.constant dense<0.000000e+00> : vector<8xf32>
    %12 = vector.multi_reduction <add>, %11, %cst_9 [1] : vector<8x16xf32> to vector<8xf32>
    %13 = vector.shape_cast %12 : vector<8xf32> to vector<8x1xf32>
    %14 = arith.addf %7, %13 : vector<8x1xf32>
    %c0_10 = arith.constant 0 : index
    %c0_11 = arith.constant 0 : index
    %15 = vector.load %arg6[%c0_10, %c0_11] : memref<8x1xf32, #tpu.memory_space<vmem>>, vector<8x1xf32>
    tpu.vector_store %arg6[%c0_10, %c0_11], %14 {strides = array<i32>} : memref<8x1xf32, #tpu.memory_space<vmem>>, vector<8x1xf32>,
    return
  }
  func.func @transform_0(%arg0: i32, %arg1: i32) -> i32 {
    %c0_i32 = arith.constant 0 : i32
    %c0_i32_0 = arith.constant 0 : i32
    return %c0_i32 : i32
  }
  func.func @transform_1(%arg0: i32, %arg1: i32) -> (i32, i32) {
    %c0_i32 = arith.constant 0 : i32
    %c0_i32_0 = arith.constant 0 : i32
    return %arg0, %c0_i32 : i32, i32
  }
  func.func @transform_2(%arg0: i32, %arg1: i32) -> (i32, i32) {
    %c0_i32 = arith.constant 0 : i32
    %c0_i32_0 = arith.constant 0 : i32
    return %c0_i32, %arg1 : i32, i32
  }
  func.func @transform_3(%arg0: i32, %arg1: i32) -> (i32, i32) {
    %c0_i32 = arith.constant 0 : i32
    return %arg0, %arg1 : i32, i32
  }
  func.func @transform_4(%arg0: i32, %arg1: i32) -> (i32, i32) {
    %c0_i32 = arith.constant 0 : i32
    %c0_i32_0 = arith.constant 0 : i32
    return %arg0, %c0_i32 : i32, i32
  }
}

</mosaic_0001>

<bundles_post_ra>
// kernel: adacos_forward.1
= control target key start
LH: loop header
LB: loop body
LE: loop exit
PB: predicated region body
PF: predicated region fallthrough
CT: control target
= control target key end

     0   :  { %vm24_vm0 = vcmask 261120   ;;  %vm41_vm4 = vcmask 257024   ;;  %vm43_vm5 = vcmask 7168   ;;  %v117_v17 = vmov 0.0   ;;  %s171_s1 = inlined_call_operand.vmem [shape: f32[8,32], index: 1, kind: input, shape index: {}]   ;;  %s172_s2 = inlined_call_operand.vmem [shape: bf16[32,16], index: 2, kind: input, shape index: {}]   ;;  %s173_s4 = inlined_call_operand.vmem [shape: f32[8,1], index: 4, kind: output, shape index: {1}]   ;;  %s174_s0 = inlined_call_operand.<no memory space> [shape: f32[1], index: 0, kind: input, shape index: {}]   ;;  %s175_s3 = inlined_call_operand.vmem [shape: f32[8,16], index: 3, kind: output, shape index: {0}]  }
   0x1   :  { %v22_v0 = vld [vmem:[%s171_s1] sm:$0xff]  ;;  %v111_v3 = vld [vmem:[%s172_s2 + $0x8] sm:$0xff]  ;;  %44 = vst.msk [vmem:[%s173_s4] sm:$0xff] %vm43_vm5, %v117_v17  ;;  %v83_v18 = vstv %s174_s0  ;;  %vm79_vm6 = vcmask 130048  }
   0x2   :  { %v23_v1 = vmul.f32 %v22_v0, %v22_v0  ;;  %72 = vmatpush.bf16.msra.mxu0 %v111_v3  ;;  %v110_v4 = vld [vmem:[%s172_s2] sm:$0xff] }
   0x4   :  { %v25_v2 = vsel %vm24_vm0, %v23_v1, 0.0 }
   0x5   :  { %26 = vadd.xlane.f32.xlu0 %v25_v2 }
   0x6   :  { %73 = vmatpush.bf16.msra.mxu0 %v110_v4 }
   0x8   :  { %v81_v25 = vld [vmem:[%s173_s4] sm:$0xff] }
  0x78   :  { %v27_v5 = vpop.xlane.xlu0 %26 }
  0x79   :  { %v28_v6 = vmax.f32 %v27_v5, 1e-24 }
  0x7b   :  { %113 = vrsqrt.f32 %v28_v6  ;;  %vm35_vm2 = vweird.f32 %v28_v6 }
  0x81   :  { %v114_v7 = vpop.eup %113 }
  0x82   :  { %v30_v8 = vmul.f32 %v114_v7, %v28_v6  ;;  %vm36_vm1 = vweird.f32 %v114_v7 }
  0x83   :  { %vm37_vm3 = vmor %vm35_vm2, %vm36_vm1 }
  0x84   :  { %v31_v9 = vmul.f32 %v114_v7, %v30_v8 }
  0x86   :  { %v32_v10 = vmul.f32 0.5, %v31_v9 }
  0x88   :  { %v33_v11 = vsub.f32 1.5, %v32_v10 }
  0x8a   :  { %v34_v12 = vmul.f32 %v114_v7, %v33_v11 }
  0x8c   :  { %v38_v13 = vsel %vm37_vm3, %v114_v7, %v34_v12 }
  0x8d   :  { %v39_v14 = vmul.f32 %v38_v13, %v22_v0 }
  0x8f   :  { %v40_v15 = vpack.c.bf16 %v39_v14, %v39_v14 }
  0x91   :  { %42 = vst.msk [vmem:[#allocation2] sm:$0xf] %vm41_vm4, %v40_v15 }
  0x98   :  { %v45_v16 = vld [vmem:[#allocation2] sm:$0xf] }
  0x99   :  { %109 = vmatmul.msk.bf16.vlgmr.msra.gmra.mxu0 %vm24_vm0, %v45_v16 }
 0x116   :  { %v75_v19 = vpop.f32.mrf.mxu0 }
 0x117   :  { %v84_v20 = vmul.f32 %v83_v18, %v75_v19  ;;  %80 = vst.msk [vmem:[%s175_s3] sm:$0xff] %vm79_vm6, %v75_v19 }
 0x119   :  { %v85_v21 = vmul.f32 1.442695, %v84_v20 }
 0x11b   :  { %115 = vpow2.f32 %v85_v21 }
 0x11e   :  { %v77_v22 = vpop.f32.mrf.mxu0 }
 0x121   :  { %v116_v23 = vpop.eup %115 }
 0x122   :  { %v87_v24 = vsel %vm79_vm6, %v116_v23, 0.0 }
 0x123   :  { %88 = vadd.xlane.f32.xlu0 %v87_v24 }
 0x196   :  { %v89_v26 = vpop.xlane.xlu0 %88 }
 0x197   :  { %v90_v27 = vadd.f32 %v89_v26, %v81_v25 }
 0x199   :  { %92 = vst.msk [vmem:[%s173_s4] sm:$0xff] %vm43_vm5, %v90_v27 }

</bundles_post_ra>
